<compile_context>
chip_gen: v7x
topology: tpu7x:2x2x1
jax: 0.10.0
libtpu: 0.0.40
codegen_flags: <defaults>
</compile_context>

<pallas_src>
import jax
import jax.numpy as jnp
from jax.experimental import pallas as pl
from jax.experimental.pallas import tpu as pltpu


def _make_conv_sq_kernel(C8, KH, KW, stride, WW, M):
    """Build a kernel specialized to the (static) conv geometry."""
    # Static (parity-plane, lane-shift) for each of the KH*KW taps:
    #   kh = stride*a + r, kw = stride*b + s
    #   tap value at output m = oh*WW + ow is plane[r*stride+s][c, m + a*WW + b]
    taps = []
    for kh in range(KH):
        a, r = divmod(kh, stride)
        for kw in range(KW):
            b, s = divmod(kw, stride)
            taps.append((r * stride + s, a * WW + b))

    def kernel(xd_ref, wb_ref, out_ref):
        # xd_ref : [stride*stride, C8, M + shift_max]  parity-deinterleaved x
        # wb_ref : [OC, (KH*KW + 1) * C8]              weights with bias folded
        # out_ref: [OC, M]                             v3 = v1*v1, lane-dense
        # In-kernel im2col: each tap is a contiguous static lane slice.
        slabs = [xd_ref[p, :, pl.ds(shift, M)] for (p, shift) in taps]
        # Bias "tap": an all-ones slab; the matching wb columns are [bias,0,..0].
        slabs.append(jnp.ones((C8, M), dtype=jnp.float32))
        patches = jnp.concatenate(slabs, axis=0)          # [K, M], K = (KH*KW+1)*C8
        v1 = jnp.dot(wb_ref[...], patches,
                     preferred_element_type=jnp.float32)  # [OC, M] conv + bias
        # Dropout2d in eval mode is identity, so v3 = v1 * v2 = v1 * v1.
        out_ref[...] = v1 * v1

    return kernel


def model_forward(x, weight, bias, *, stride=2):
    """x: [N, C, H, W]; weight: [OC, C, KH, KW]; bias: [OC] -> [N, OC, OH, OW]."""
    N, C, H, W = x.shape
    OC, Cw, KH, KW = weight.shape
    assert Cw == C
    assert H % stride == 0 and W % stride == 0, "parity split needs H,W % stride == 0"

    OH = (H - KH) // stride + 1
    OW = (W - KW) // stride + 1
    HH, WW = H // stride, W // stride          # parity-grid extents (16, 16)
    M = HH * WW                                # lane-dense output width (256)
    C8 = ((C + 7) // 8) * 8                    # channels padded to a sublane group
    shift_max = ((KH - 1) // stride) * WW + (KW - 1) // stride
    P = stride * stride
    f32 = jnp.float32

    # ---- weight packing (tiny, once, in XLA): [OC, (KH*KW+1)*C8] -----------
    # column ((kh*KW + kw)*C8 + c) = weight[oc, c, kh, kw]; last C8 columns are
    # [bias, 0, ..., 0] and pair with the all-ones slab inside the kernel.
    w_p = jnp.pad(weight.astype(f32), ((0, 0), (0, C8 - C), (0, 0), (0, 0)))
    w_p = jnp.transpose(w_p, (0, 2, 3, 1)).reshape(OC, KH * KW * C8)
    bias_cols = jnp.zeros((OC, C8), f32).at[:, 0].set(bias.astype(f32))
    wb = jnp.concatenate([w_p, bias_cols], axis=1)

    kernel = _make_conv_sq_kernel(C8, KH, KW, stride, WW, M)
    vmem = pl.BlockSpec(memory_space=pltpu.MemorySpace.VMEM)
    conv_sq = pl.pallas_call(
        kernel,
        out_shape=jax.ShapeDtypeStruct((OC, M), f32),
        in_specs=[vmem, vmem],     # whole-array VMEM operands, no grid
        out_specs=vmem,
    )

    outs = []
    for n in range(N):  # module uses N == 1; trivial static loop keeps batch support
        # parity deinterleave: xd[r*stride+s, c, i*WW+j] = x[n, c, stride*i+r, stride*j+s]
        xd = x[n].astype(f32).reshape(C, HH, stride, WW, stride)
        xd = jnp.transpose(xd, (2, 4, 0, 1, 3)).reshape(P, C, M)
        xd = jnp.pad(xd, ((0, 0), (0, C8 - C), (0, shift_max)))  # [P, C8, M+shift_max]
        out = conv_sq(xd, wb)                                    # [OC, M]
        outs.append(out.reshape(OC, HH, WW)[:, :OH, :OW])        # drop invalid border
    return jnp.stack(outs, axis=0)                               # [N, OC, OH, OW]


if __name__ == "__main__":
    key = jax.random.PRNGKey(0)
    k_x, k_w, k_b = jax.random.split(key, 3)

    # shapes implied by the module: x1 = randn(1, 6, 32, 32), Conv2d(6, 16, 5, stride=2)
    x1 = jax.random.normal(k_x, (1, 6, 32, 32), dtype=jnp.float32)
    weight = jax.random.normal(k_w, (16, 6, 5, 5), dtype=jnp.float32) * 0.1
    bias = jax.random.normal(k_b, (16,), dtype=jnp.float32) * 0.1

    fwd = jax.jit(model_forward)
    out = jax.block_until_ready(fwd(x1, weight, bias))

    # sanity: XLA reference conv, then v1*v1 (eval-mode dropout == identity)
    v1_ref = jax.lax.conv_general_dilated(
        x1, weight, window_strides=(2, 2), padding="VALID",
        dimension_numbers=("NCHW", "OIHW", "NCHW")) + bias.reshape(1, -1, 1, 1)
    ref = v1_ref * v1_ref
    assert out.shape == (1, 16, 14, 14)
    assert jnp.allclose(out, ref, atol=2e-3, rtol=2e-3), float(jnp.max(jnp.abs(out - ref)))

    print("KERNEL_OK")
</pallas_src>

<mosaic_0001>
module attributes {stable_mosaic.version = 11 : i64} {
  func.func @kernel(%arg0: memref<4x8x290xf32, #tpu.memory_space<vmem>>, %arg1: memref<16x208xf32, #tpu.memory_space<vmem>>, %arg2: memref<16x256xf32, #tpu.memory_space<vmem>>) attributes {dimension_semantics = [], scalar_prefetch = 0 : i64, scratch_operands = 0 : i64, tpu.core_type = #tpu.core_type<tc>} {
    %c0 = arith.constant 0 : index
    %c0_0 = arith.constant 0 : index
    %c0_1 = arith.constant 0 : index
    %0 = vector.load %arg0[%c0, %c0_0, %c0_1] : memref<4x8x290xf32, #tpu.memory_space<vmem>>, vector<1x8x256xf32>
    %1 = vector.shape_cast %0 : vector<1x8x256xf32> to vector<8x256xf32>
    %c1 = arith.constant 1 : index
    %c0_2 = arith.constant 0 : index
    %c0_3 = arith.constant 0 : index
    %2 = vector.load %arg0[%c1, %c0_2, %c0_3] : memref<4x8x290xf32, #tpu.memory_space<vmem>>, vector<1x8x256xf32>
    %3 = vector.shape_cast %2 : vector<1x8x256xf32> to vector<8x256xf32>
    %c0_4 = arith.constant 0 : index
    %c0_5 = arith.constant 0 : index
    %c1_6 = arith.constant 1 : index
    %4 = vector.load %arg0[%c0_4, %c0_5, %c1_6] : memref<4x8x290xf32, #tpu.memory_space<vmem>>, vector<1x8x256xf32>
    %5 = vector.shape_cast %4 : vector<1x8x256xf32> to vector<8x256xf32>
    %c1_7 = arith.constant 1 : index
    %c0_8 = arith.constant 0 : index
    %c1_9 = arith.constant 1 : index
    %6 = vector.load %arg0[%c1_7, %c0_8, %c1_9] : memref<4x8x290xf32, #tpu.memory_space<vmem>>, vector<1x8x256xf32>
    %7 = vector.shape_cast %6 : vector<1x8x256xf32> to vector<8x256xf32>
    %c0_10 = arith.constant 0 : index
    %c0_11 = arith.constant 0 : index
    %c2 = arith.constant 2 : index
    %8 = vector.load %arg0[%c0_10, %c0_11, %c2] : memref<4x8x290xf32, #tpu.memory_space<vmem>>, vector<1x8x256xf32>
    %9 = vector.shape_cast %8 : vector<1x8x256xf32> to vector<8x256xf32>
    %c2_12 = arith.constant 2 : index
    %c0_13 = arith.constant 0 : index
    %c0_14 = arith.constant 0 : index
    %10 = vector.load %arg0[%c2_12, %c0_13, %c0_14] : memref<4x8x290xf32, #tpu.memory_space<vmem>>, vector<1x8x256xf32>
    %11 = vector.shape_cast %10 : vector<1x8x256xf32> to vector<8x256xf32>
    %c3 = arith.constant 3 : index
    %c0_15 = arith.constant 0 : index
    %c0_16 = arith.constant 0 : index
    %12 = vector.load %arg0[%c3, %c0_15, %c0_16] : memref<4x8x290xf32, #tpu.memory_space<vmem>>, vector<1x8x256xf32>
    %13 = vector.shape_cast %12 : vector<1x8x256xf32> to vector<8x256xf32>
    %c2_17 = arith.constant 2 : index
    %c0_18 = arith.constant 0 : index
    %c1_19 = arith.constant 1 : index
    %14 = vector.load %arg0[%c2_17, %c0_18, %c1_19] : memref<4x8x290xf32, #tpu.memory_space<vmem>>, vector<1x8x256xf32>
    %15 = vector.shape_cast %14 : vector<1x8x256xf32> to vector<8x256xf32>
    %c3_20 = arith.constant 3 : index
    %c0_21 = arith.constant 0 : index
    %c1_22 = arith.constant 1 : index
    %16 = vector.load %arg0[%c3_20, %c0_21, %c1_22] : memref<4x8x290xf32, #tpu.memory_space<vmem>>, vector<1x8x256xf32>
    %17 = vector.shape_cast %16 : vector<1x8x256xf32> to vector<8x256xf32>
    %c2_23 = arith.constant 2 : index
    %c0_24 = arith.constant 0 : index
    %c2_25 = arith.constant 2 : index
    %18 = vector.load %arg0[%c2_23, %c0_24, %c2_25] : memref<4x8x290xf32, #tpu.memory_space<vmem>>, vector<1x8x256xf32>
    %19 = vector.shape_cast %18 : vector<1x8x256xf32> to vector<8x256xf32>
    %c0_26 = arith.constant 0 : index
    %c0_27 = arith.constant 0 : index
    %c16 = arith.constant 16 : index
    %20 = vector.load %arg0[%c0_26, %c0_27, %c16] : memref<4x8x290xf32, #tpu.memory_space<vmem>>, vector<1x8x256xf32>
    %21 = vector.shape_cast %20 : vector<1x8x256xf32> to vector<8x256xf32>
    %c1_28 = arith.constant 1 : index
    %c0_29 = arith.constant 0 : index
    %c16_30 = arith.constant 16 : index
    %22 = vector.load %arg0[%c1_28, %c0_29, %c16_30] : memref<4x8x290xf32, #tpu.memory_space<vmem>>, vector<1x8x256xf32>
    %23 = vector.shape_cast %22 : vector<1x8x256xf32> to vector<8x256xf32>
    %c0_31 = arith.constant 0 : index
    %c0_32 = arith.constant 0 : index
    %c17 = arith.constant 17 : index
    %24 = vector.load %arg0[%c0_31, %c0_32, %c17] : memref<4x8x290xf32, #tpu.memory_space<vmem>>, vector<1x8x256xf32>
    %25 = vector.shape_cast %24 : vector<1x8x256xf32> to vector<8x256xf32>
    %c1_33 = arith.constant 1 : index
    %c0_34 = arith.constant 0 : index
    %c17_35 = arith.constant 17 : index
    %26 = vector.load %arg0[%c1_33, %c0_34, %c17_35] : memref<4x8x290xf32, #tpu.memory_space<vmem>>, vector<1x8x256xf32>
    %27 = vector.shape_cast %26 : vector<1x8x256xf32> to vector<8x256xf32>
    %c0_36 = arith.constant 0 : index
    %c0_37 = arith.constant 0 : index
    %c18 = arith.constant 18 : index
    %28 = vector.load %arg0[%c0_36, %c0_37, %c18] : memref<4x8x290xf32, #tpu.memory_space<vmem>>, vector<1x8x256xf32>
    %29 = vector.shape_cast %28 : vector<1x8x256xf32> to vector<8x256xf32>
    %c2_38 = arith.constant 2 : index
    %c0_39 = arith.constant 0 : index
    %c16_40 = arith.constant 16 : index
    %30 = vector.load %arg0[%c2_38, %c0_39, %c16_40] : memref<4x8x290xf32, #tpu.memory_space<vmem>>, vector<1x8x256xf32>
    %31 = vector.shape_cast %30 : vector<1x8x256xf32> to vector<8x256xf32>
    %c3_41 = arith.constant 3 : index
    %c0_42 = arith.constant 0 : index
    %c16_43 = arith.constant 16 : index
    %32 = vector.load %arg0[%c3_41, %c0_42, %c16_43] : memref<4x8x290xf32, #tpu.memory_space<vmem>>, vector<1x8x256xf32>
    %33 = vector.shape_cast %32 : vector<1x8x256xf32> to vector<8x256xf32>
    %c2_44 = arith.constant 2 : index
    %c0_45 = arith.constant 0 : index
    %c17_46 = arith.constant 17 : index
    %34 = vector.load %arg0[%c2_44, %c0_45, %c17_46] : memref<4x8x290xf32, #tpu.memory_space<vmem>>, vector<1x8x256xf32>
    %35 = vector.shape_cast %34 : vector<1x8x256xf32> to vector<8x256xf32>
    %c3_47 = arith.constant 3 : index
    %c0_48 = arith.constant 0 : index
    %c17_49 = arith.constant 17 : index
    %36 = vector.load %arg0[%c3_47, %c0_48, %c17_49] : memref<4x8x290xf32, #tpu.memory_space<vmem>>, vector<1x8x256xf32>
    %37 = vector.shape_cast %36 : vector<1x8x256xf32> to vector<8x256xf32>
    %c2_50 = arith.constant 2 : index
    %c0_51 = arith.constant 0 : index
    %c18_52 = arith.constant 18 : index
    %38 = vector.load %arg0[%c2_50, %c0_51, %c18_52] : memref<4x8x290xf32, #tpu.memory_space<vmem>>, vector<1x8x256xf32>
    %39 = vector.shape_cast %38 : vector<1x8x256xf32> to vector<8x256xf32>
    %c0_53 = arith.constant 0 : index
    %c0_54 = arith.constant 0 : index
    %c32 = arith.constant 32 : index
    %40 = vector.load %arg0[%c0_53, %c0_54, %c32] : memref<4x8x290xf32, #tpu.memory_space<vmem>>, vector<1x8x256xf32>
    %41 = vector.shape_cast %40 : vector<1x8x256xf32> to vector<8x256xf32>
    %c1_55 = arith.constant 1 : index
    %c0_56 = arith.constant 0 : index
    %c32_57 = arith.constant 32 : index
    %42 = vector.load %arg0[%c1_55, %c0_56, %c32_57] : memref<4x8x290xf32, #tpu.memory_space<vmem>>, vector<1x8x256xf32>
    %43 = vector.shape_cast %42 : vector<1x8x256xf32> to vector<8x256xf32>
    %c0_58 = arith.constant 0 : index
    %c0_59 = arith.constant 0 : index
    %c33 = arith.constant 33 : index
    %44 = vector.load %arg0[%c0_58, %c0_59, %c33] : memref<4x8x290xf32, #tpu.memory_space<vmem>>, vector<1x8x256xf32>
    %45 = vector.shape_cast %44 : vector<1x8x256xf32> to vector<8x256xf32>
    %c1_60 = arith.constant 1 : index
    %c0_61 = arith.constant 0 : index
    %c33_62 = arith.constant 33 : index
    %46 = vector.load %arg0[%c1_60, %c0_61, %c33_62] : memref<4x8x290xf32, #tpu.memory_space<vmem>>, vector<1x8x256xf32>
    %47 = vector.shape_cast %46 : vector<1x8x256xf32> to vector<8x256xf32>
    %c0_63 = arith.constant 0 : index
    %c0_64 = arith.constant 0 : index
    %c34 = arith.constant 34 : index
    %48 = vector.load %arg0[%c0_63, %c0_64, %c34] : memref<4x8x290xf32, #tpu.memory_space<vmem>>, vector<1x8x256xf32>
    %49 = vector.shape_cast %48 : vector<1x8x256xf32> to vector<8x256xf32>
    %cst = arith.constant 1.000000e+00 : f32
    %50 = vector.broadcast %cst : f32 to vector<8x256xf32>
    %51 = tpu.concatenate %1, %3, %5, %7, %9, %11, %13, %15, %17, %19, %21, %23, %25, %27, %29, %31 in 0 : vector<8x256xf32>, vector<8x256xf32>, vector<8x256xf32>, vector<8x256xf32>, vector<8x256xf32>, vector<8x256xf32>, vector<8x256xf32>, vector<8x256xf32>, vector<8x256xf32>, vector<8x256xf32>, vector<8x256xf32>, vector<8x256xf32>, vector<8x256xf32>, vector<8x256xf32>, vector<8x256xf32>, vector<8x256xf32> -> vector<128x256xf32>
    %52 = tpu.concatenate %33, %35, %37, %39, %41, %43, %45, %47, %49, %50 in 0 : vector<8x256xf32>, vector<8x256xf32>, vector<8x256xf32>, vector<8x256xf32>, vector<8x256xf32>, vector<8x256xf32>, vector<8x256xf32>, vector<8x256xf32>, vector<8x256xf32>, vector<8x256xf32> -> vector<80x256xf32>
    %53 = tpu.concatenate %51, %52 in 0 : vector<128x256xf32>, vector<80x256xf32> -> vector<208x256xf32>
    %c0_65 = arith.constant 0 : index
    %c0_66 = arith.constant 0 : index
    %54 = vector.load %arg1[%c0_65, %c0_66] : memref<16x208xf32, #tpu.memory_space<vmem>>, vector<16x208xf32>
    %cst_67 = arith.constant dense<0.000000e+00> : vector<16x256xf32>
    %55 = tpu.matmul %54, %53, %cst_67 {dimension_numbers = #tpu.dot_dimension_numbers<[1], [0], [0], [1], [0, 0, 1, 1], [], []>} : vector<16x208xf32>, vector<208x256xf32>, vector<16x256xf32> -> vector<16x256xf32>
    %56 = arith.mulf %55, %55 : vector<16x256xf32>
    %c0_68 = arith.constant 0 : index
    %c0_69 = arith.constant 0 : index
    %57 = vector.load %arg2[%c0_68, %c0_69] : memref<16x256xf32, #tpu.memory_space<vmem>>, vector<16x256xf32>
    tpu.vector_store %arg2[%c0_68, %c0_69], %56 {strides = array<i32>} : memref<16x256xf32, #tpu.memory_space<vmem>>, vector<16x256xf32>,
    return
  }
}

</mosaic_0001>

<bundles_post_ra>
// kernel: model_forward.1
= control target key start
LH: loop header
LB: loop body
LE: loop exit
PB: predicated region body
PF: predicated region fallthrough
CT: control target
= control target key end

     0   :  { %s602_s21 = smov 127   ;;  %s603_s26 = smov 126   ;;  %vm35_vm0 = vcmask 1039360   ;;  %vm59_vm1 = vcmask 1031168   ;;  %vm106_vm2 = vcmask 916480   ;;  %vm127_vm3 = vcmask 908288   ;;  %s840_s0 = inlined_call_operand.vmem [shape: f32[4,8,290], index: 0, kind: input, shape index: {}]   ;;  %s841_s1 = inlined_call_operand.vmem [shape: f32[16,208], index: 1, kind: input, shape index: {}]   ;;  %s842_s2 = inlined_call_operand.vmem [shape: f32[16,256], index: 2, kind: output, shape index: {}]  }
   0x1   :  { %v626_v0 = vld [vmem:[%s840_s0 + $0x48] sm:$0xff]  ;;  %v631_v1 = vld [vmem:[%s840_s0 + $0x58] sm:$0xff]  ;;  %v364_v4 = vld [vmem:[%s840_s0 + $0x40] sm:$0xff]  ;;  %s604_s7 = smov 112   ;;  %s605_s8 = smov 111   ;;  %vm148_vm4 = vcmask 900096  }
   0x2   :  { %v636_v2 = vld [vmem:[%s840_s0 + $0x38] sm:$0xff]  ;;  %v462_v3 = vpack.i.bf16 %v626_v0, %v631_v1  ;;  %v646_v5 = vld [vmem:[%s840_s0 + $0x30] sm:$0xff]  ;;  %v12_v9 = vld [vmem:[%s840_s0 + $0x8] sm:$0xff]  ;;  %vm261_vm5 = vcmask 654336  }
   0x3   :  { %v651_v6 = vld [vmem:[%s840_s0 + $0x50] sm:$0xff]  ;;  %v452_v7 = vpack.i.bf16 %v364_v4, %v636_v2  ;;  %v11_v12 = vld [vmem:[%s840_s0] sm:$0xff]  ;;  %v357_v13 = vld [vmem:[%s840_s0 + $0x18] sm:$0xff] }
   0x4   :  { %463 = vrot.lane.b32.xlu1 %v462_v3, %s602_s21  ;;  %v457_v8 = vpack.i.bf16 %v651_v6, %v646_v5  ;;  %v16_v10 = vld [vmem:[%s840_s0 + $0x10] sm:$0xff]  ;;  %v358_v14 = vld [vmem:[%s840_s0 + $0x20] sm:$0xff]  ;;  %v359_v15 = vld [vmem:[%s840_s0 + $0x28] sm:$0xff]  ;;  %v482_v16 = vpack.i.bf16 %v357_v13, %v11_v12  ;;  %v370_v19 = vpack.c.bf16 %v357_v13, %v11_v12  ;;  %s606_s0 = smov 110  }
   0x5   :  { %453 = vrot.lane.b32.xlu0 %v452_v7, %s602_s21  ;;  %v472_v11 = vpack.i.bf16 %v16_v10, %v12_v9  ;;  %v477_v17 = vpack.i.bf16 %v359_v15, %v358_v14  ;;  %v368_v18 = vpack.c.bf16 %v358_v14, %v12_v9 }
   0x7   :  { %369 = vmatprep.subr.bf16.mxu0 %v368_v18  ;;  %420 = vmatprep.subr.bf16.mxu1 %v368_v18 }
   0x8   :  { %468 = vrot.lane.b32.xlu1 %v452_v7, %s603_s26  ;;  %371 = vmatpush1.bf16.msra.mxu0 %v370_v19 }
   0x9   :  { %458 = vrot.lane.b32.xlu0 %v457_v8, %s602_s21  ;;  %433 = vmatpush1.bf16.msra.mxu1 %v370_v19 }
   0xc   :  { %473 = vrot.lane.b32.xlu1 %v472_v11, %s604_s7 }
   0xd   :  { %90 = vrot.lane.b32.xlu0 %v646_v5, %s603_s26 }
  0x10   :  { %483 = vrot.lane.b32.xlu1 %v482_v16, %s604_s7 }
  0x11   :  { %478 = vrot.lane.b32.xlu0 %v477_v17, %s604_s7 }
  0x14   :  { %493 = vrot.lane.b32.xlu1 %v477_v17, %s605_s8 }
  0x15   :  { %488 = vrot.lane.b32.xlu0 %v472_v11, %s605_s8 }
  0x18   :  { %503 = vrot.lane.b32.xlu1 %v472_v11, %s606_s0 }
  0x19   :  { %498 = vrot.lane.b32.xlu0 %v482_v16, %s605_s8 }
  0x1c   :  { %508 = vrot.lane.b32.xlu1 %v472_v11, %s602_s21 }
  0x1d   :  { %142 = vrot.lane.b32.xlu0 %v11_v12, %s606_s0 }
  0x20   :  { %518 = vrot.lane.b32.xlu1 %v482_v16, %s602_s21 }
  0x21   :  { %513 = vrot.lane.b32.xlu0 %v477_v17, %s602_s21 }
  0x24   :  { %53 = vrot.lane.b32.xlu1 %v11_v12, %s603_s26 }
  0x25   :  { %523 = vrot.lane.b32.xlu0 %v472_v11, %s603_s26 }
  0x28   :  { %533 = vrot.lane.b32.xlu1 %v457_v8, %s604_s7 }
  0x29   :  { %528 = vrot.lane.b32.xlu0 %v452_v7, %s604_s7 }
  0x76   :  { %v464_v20 = vpop.permute.xlu1 %463 }
  0x77   :  { %v454_v21 = vpop.permute.xlu0 %453  ;;  %v465_v31 = vunpack.i.l.bf16 %v464_v20  ;;  %v466_v35 = vunpack.i.h.bf16 %v464_v20 }
  0x78   :  { %v456_v22 = vunpack.i.h.bf16 %v454_v21  ;;  %v455_v23 = vunpack.i.l.bf16 %v454_v21 }
  0x7a   :  { %v537_v24 = vpack.i.bf16 %v626_v0, %v456_v22  ;;  %v469_v25 = vpop.permute.xlu1 %468  ;;  %v692_v26 = vsel %vm35_vm0, %v455_v23, %v456_v22 }
  0x7b   :  { %v471_v27 = vunpack.i.h.bf16 %v469_v25  ;;  %v470_v28 = vunpack.i.l.bf16 %v469_v25  ;;  %v459_v29 = vpop.permute.xlu0 %458  ;;  %v542_v30 = vpack.i.bf16 %v692_v26, %v631_v1 }
  0x7c   :  { %v461_v32 = vunpack.i.h.bf16 %v459_v29  ;;  %v460_v33 = vunpack.i.l.bf16 %v459_v29  ;;  %538 = vrot.lane.b32.xlu1 %v537_v24, %s604_s7  ;;  %v260_v24 = vld [vmem:[%s841_s1 + $0x18] sm:$0xff] }
  0x7d   :  { %543 = vrot.lane.b32.xlu0 %v542_v30, %s604_s7  ;;  %v699_v34 = vsel %vm59_vm1, %v470_v28, %v471_v27  ;;  %367 = vmatprep.mubr.msk.f32.mxu1 %vm261_vm5, %v260_v24 }
  0x7e   :  { %v474_v36 = vpop.permute.xlu1 %473  ;;  %v702_v37 = vsel %vm35_vm0, %v460_v33, %v455_v23  ;;  %v705_v38 = vsel %vm35_vm0, %v461_v32, %v465_v31  ;;  %v552_v39 = vpack.i.bf16 %v699_v34, %v465_v31  ;;  %v711_v44 = vsel %vm35_vm0, %v466_v35, %v461_v32  ;;  %v258_v23 = vld [vmem:[%s841_s1 + $0x8] sm:$0xff] }
  0x7f   :  { %v91_v40 = vpop.permute.xlu0 %90  ;;  %v476_v41 = vunpack.i.h.bf16 %v474_v36  ;;  %v475_v42 = vunpack.i.l.bf16 %v474_v36  ;;  %v547_v43 = vpack.i.bf16 %v705_v38, %v702_v37  ;;  %v557_v51 = vpack.i.bf16 %v711_v44, %v471_v27  ;;  %366 = vmatprep.mubr.msk.f32.mxu0 %vm261_vm5, %v258_v23 }
  0x80   :  { %553 = vrot.lane.b32.xlu1 %v552_v39, %s604_s7  ;;  %v715_v45 = vsel %vm59_vm1, %v91_v40, %v470_v28  ;;  %v607_v40 = vmov 1.0  }
  0x81   :  { %548 = vrot.lane.b32.xlu0 %v547_v43, %s604_s7  ;;  %v719_v46 = vsel %vm106_vm2, %v475_v42, %v476_v41 }
  0x82   :  { %v484_v47 = vpop.permute.xlu1 %483  ;;  %v562_v48 = vpack.i.bf16 %v719_v46, %v715_v45 }
  0x83   :  { %v479_v49 = vpop.permute.xlu0 %478  ;;  %v485_v50 = vunpack.i.l.bf16 %v484_v47  ;;  %v486_v55 = vunpack.i.h.bf16 %v484_v47 }
  0x84   :  { %v481_v52 = vunpack.i.h.bf16 %v479_v49  ;;  %v480_v53 = vunpack.i.l.bf16 %v479_v49  ;;  %563 = vrot.lane.b32.xlu1 %v562_v48, %s604_s7 }
  0x85   :  { %558 = vrot.lane.b32.xlu0 %v557_v51, %s604_s7  ;;  %v727_v54 = vsel %vm106_vm2, %v485_v50, %v475_v42 }
  0x86   :  { %v494_v56 = vpop.permute.xlu1 %493  ;;  %v730_v57 = vsel %vm106_vm2, %v480_v53, %v481_v52  ;;  %v572_v58 = vpack.i.bf16 %v727_v54, %v481_v52  ;;  %v740_v7 = vsel %vm106_vm2, %v486_v55, %v480_v53 }
  0x87   :  { %v489_v59 = vpop.permute.xlu0 %488  ;;  %v496_v60 = vunpack.i.h.bf16 %v494_v56  ;;  %v495_v61 = vunpack.i.l.bf16 %v494_v56  ;;  %v567_v62 = vpack.i.bf16 %v730_v57, %v476_v41 }
  0x88   :  { %v491_v63 = vunpack.i.h.bf16 %v489_v59  ;;  %v490_v1 = vunpack.i.l.bf16 %v489_v59  ;;  %573 = vrot.lane.b32.xlu1 %v572_v58, %s604_s7  ;;  %v380_v59 = vpack.c.bf16 %v692_v26, %v651_v6  ;;  %v388_v6 = vpack.c.bf16 %v730_v57, %v719_v46 }
  0x89   :  { %568 = vrot.lane.b32.xlu0 %v567_v62, %s604_s7  ;;  %v737_v3 = vsel %vm127_vm3, %v495_v61, %v496_v60 }
  0x8a   :  { %v504_v4 = vpop.permute.xlu1 %503  ;;  %v743_v8 = vsel %vm127_vm3, %v490_v1, %v491_v63  ;;  %v582_v9 = vpack.i.bf16 %v737_v3, %v491_v63 }
  0x8b   :  { %v499_v10 = vpop.permute.xlu0 %498  ;;  %v506_v11 = vunpack.i.h.bf16 %v504_v4  ;;  %v505_v12 = vunpack.i.l.bf16 %v504_v4  ;;  %v577_v13 = vpack.i.bf16 %v743_v8, %v740_v7 }
  0x8c   :  { %v501_v14 = vunpack.i.h.bf16 %v499_v10  ;;  %v500_v15 = vunpack.i.l.bf16 %v499_v10  ;;  %583 = vrot.lane.b32.xlu1 %v582_v9, %s604_s7 }
  0x8d   :  { %578 = vrot.lane.b32.xlu0 %v577_v13, %s604_s7  ;;  %v751_v16 = vsel %vm148_vm4, %v505_v12, %v506_v11 }
  0x8e   :  { %v509_v17 = vpop.permute.xlu1 %508  ;;  %v754_v18 = vsel %vm127_vm3, %v500_v15, %v490_v1  ;;  %v757_v19 = vsel %vm127_vm3, %v501_v14, %v495_v61  ;;  %v384_v61 = vpack.c.bf16 %v699_v34, %v705_v38 }
  0x8f   :  { %v143_v20 = vpop.permute.xlu0 %142  ;;  %v587_v21 = vpack.i.bf16 %v754_v18, %v496_v60  ;;  %v592_v22 = vpack.i.bf16 %v751_v16, %v757_v19  ;;  %v511_v27 = vunpack.i.h.bf16 %v509_v17  ;;  %v510_v28 = vunpack.i.l.bf16 %v509_v17 }
  0x90   :  { %v769_v25 = vsel %vm148_vm4, %v143_v20, %v505_v12  ;;  %v382_v60 = vpack.c.bf16 %v702_v37, %v626_v0  ;;  %v390_v0 = vpack.c.bf16 %v740_v7, %v727_v54  ;;  %v392_v37 = vpack.c.bf16 %v737_v3, %v743_v8 }
  0x91   :  { %588 = vrot.lane.b32.xlu0 %v587_v21, %s604_s7  ;;  %593 = vrot.lane.b32.xlu1 %v592_v22, %s604_s7  ;;  %v597_v30 = vpack.i.bf16 %v769_v25, %v506_v11  ;;  %v37_v39 = vsel %vm35_vm0, %v510_v28, %v511_v27 }
  0x92   :  { %v519_v29 = vpop.permute.xlu1 %518 }
  0x93   :  { %v514_v31 = vpop.permute.xlu0 %513  ;;  %v521_v32 = vunpack.i.h.bf16 %v519_v29  ;;  %v520_v33 = vunpack.i.l.bf16 %v519_v29 }
  0x94   :  { %v516_v35 = vunpack.i.h.bf16 %v514_v31  ;;  %v515_v36 = vunpack.i.l.bf16 %v514_v31 }
  0x95   :  { %598 = vrot.lane.b32.xlu0 %v597_v30, %s604_s7  ;;  %218 = vrot.lane.b32.xlu1 %v607_v40, %s604_s7  ;;  %v36_v41 = vsel %vm35_vm0, %v520_v33, %v510_v28 }
  0x96   :  { %v50_v42 = vsel %vm35_vm0, %v515_v36, %v516_v35  ;;  %v49_v43 = vsel %vm35_vm0, %v521_v32, %v515_v36  ;;  %v54_v52 = vpop.permute.xlu1 %53 }
  0x97   :  { %v524_v47 = vpop.permute.xlu0 %523  ;;  %v372_v48 = vpack.c.bf16 %v50_v42, %v37_v39  ;;  %v374_v49 = vpack.c.bf16 %v49_v43, %v36_v41 }
  0x98   :  { %v526_v50 = vunpack.i.h.bf16 %v524_v47  ;;  %v525_v51 = vunpack.i.l.bf16 %v524_v47 }
  0x99   :  { %373 = vmatprep.subr.bf16.mxu0 %v372_v48  ;;  %421 = vmatprep.subr.bf16.mxu1 %v372_v48 }
  0x9a   :  { %v60_v53 = vsel %vm59_vm1, %v54_v52, %v525_v51  ;;  %375 = vmatpush1.bf16.msra.mxu0 %v374_v49  ;;  %434 = vmatpush1.bf16.msra.mxu1 %v374_v49  ;;  %v61_v55 = vsel %vm59_vm1, %v525_v51, %v526_v50  ;;  %v534_v63 = vpop.permute.xlu1 %533 }
  0x9b   :  { %v378_v56 = vpack.c.bf16 %v646_v5, %v60_v53  ;;  %v376_v58 = vpack.c.bf16 %v636_v2, %v61_v55  ;;  %v529_v5 = vpop.permute.xlu0 %528  ;;  %v386_v2 = vpack.c.bf16 %v715_v45, %v711_v44  ;;  %v535_v34 = vunpack.i.l.bf16 %v534_v63 }
  0x9c   :  { %v531_v26 = vunpack.i.h.bf16 %v529_v5  ;;  %v530_v62 = vunpack.i.l.bf16 %v529_v5  ;;  %v394_v44 = vpack.c.bf16 %v757_v19, %v754_v18  ;;  %v536_v4 = vunpack.i.h.bf16 %v534_v63 }
  0x9d   :  { %377 = vmatprep.subr.bf16.mxu0 %v376_v58  ;;  %422 = vmatprep.subr.bf16.mxu1 %v376_v58 }
  0x9e   :  { %379 = vmatpush1.bf16.msra.mxu0 %v378_v56  ;;  %435 = vmatpush1.bf16.msra.mxu1 %v378_v56  ;;  %v160_v38 = vsel %vm106_vm2, %v530_v62, %v531_v26  ;;  %v159_v46 = vsel %vm106_vm2, %v535_v34, %v530_v62 }
  0x9f   :  { %381 = vmatprep.subr.bf16.mxu0 %v380_v59  ;;  %423 = vmatprep.subr.bf16.mxu1 %v380_v59  ;;  %v396_v45 = vpack.c.bf16 %v160_v38, %v751_v16  ;;  %v398_v54 = vpack.c.bf16 %v159_v46, %v769_v25 }
  0xa2   :  { %383 = vmatpush1.bf16.msra.mxu0 %v382_v60  ;;  %436 = vmatpush1.bf16.msra.mxu1 %v382_v60 }
  0xa3   :  { %385 = vmatprep.subr.bf16.mxu0 %v384_v61  ;;  %424 = vmatprep.subr.bf16.mxu1 %v384_v61 }
  0xa6   :  { %387 = vmatpush1.bf16.msra.mxu0 %v386_v2  ;;  %437 = vmatpush1.bf16.msra.mxu1 %v386_v2 }
  0xa7   :  { %389 = vmatprep.subr.bf16.mxu0 %v388_v6  ;;  %425 = vmatprep.subr.bf16.mxu1 %v388_v6 }
  0xaa   :  { %391 = vmatpush1.bf16.msra.mxu0 %v390_v0  ;;  %438 = vmatpush1.bf16.msra.mxu1 %v390_v0 }
  0xab   :  { %393 = vmatprep.subr.bf16.mxu0 %v392_v37  ;;  %426 = vmatprep.subr.bf16.mxu1 %v392_v37 }
  0xae   :  { %395 = vmatpush1.bf16.msra.mxu0 %v394_v44  ;;  %439 = vmatpush1.bf16.msra.mxu1 %v394_v44 }
  0xaf   :  { %397 = vmatprep.subr.bf16.mxu0 %v396_v45  ;;  %427 = vmatprep.subr.bf16.mxu1 %v396_v45 }
  0xb2   :  { %399 = vmatpush1.bf16.msra.mxu0 %v398_v54  ;;  %440 = vmatpush1.bf16.msra.mxu1 %v398_v54 }
  0xee   :  { %v539_v57 = vpop.permute.xlu1 %538 }
  0xef   :  { %v540_v1 = vunpack.i.l.bf16 %v539_v57  ;;  %v544_v3 = vpop.permute.xlu0 %543  ;;  %v541_v9 = vunpack.i.h.bf16 %v539_v57 }
  0xf0   :  { %v546_v7 = vunpack.i.h.bf16 %v544_v3  ;;  %v545_v8 = vunpack.i.l.bf16 %v544_v3 }
  0xf1   :  { %v220_v19 = vsel %vm106_vm2, %v541_v9, %v536_v4  ;;  %v259_v9 = vld [vmem:[%s841_s1 + $0x10] sm:$0xff] }
  0xf2   :  { %v554_v10 = vpop.permute.xlu1 %553  ;;  %v221_v11 = vsel %vm106_vm2, %v536_v4, %v545_v8  ;;  %v223_v12 = vsel %vm106_vm2, %v546_v7, %v540_v1  ;;  %v257_v8 = vld [vmem:[%s841_s1] sm:$0xff] }
  0xf3   :  { %v549_v13 = vpop.permute.xlu0 %548  ;;  %v400_v14 = vpack.c.bf16 %v223_v12, %v221_v11  ;;  %v555_v17 = vunpack.i.l.bf16 %v554_v10  ;;  %v556_v21 = vunpack.i.h.bf16 %v554_v10 }
  0xf4   :  { %v550_v15 = vunpack.i.l.bf16 %v549_v13  ;;  %v551_v16 = vunpack.i.h.bf16 %v549_v13 }
  0xf5   :  { %401 = vmatprep.subr.bf16.mxu0 %v400_v14  ;;  %428 = vmatprep.subr.bf16.mxu1 %v400_v14 }
  0xf6   :  { %v564_v18 = vpop.permute.xlu1 %563  ;;  %v222_v20 = vsel %vm106_vm2, %v550_v15, %v546_v7  ;;  %v225_v30 = vsel %vm106_vm2, %v551_v16, %v555_v17 }
  0xf7   :  { %v559_v22 = vpop.permute.xlu0 %558  ;;  %v565_v23 = vunpack.i.l.bf16 %v564_v18  ;;  %v402_v24 = vpack.c.bf16 %v222_v20, %v220_v19  ;;  %v566_v40 = vunpack.i.h.bf16 %v564_v18 }
  0xf8   :  { %v561_v25 = vunpack.i.h.bf16 %v559_v22  ;;  %v560_v27 = vunpack.i.l.bf16 %v559_v22 }
  0xf9   :  { %403 = vmatpush1.bf16.msra.mxu0 %v402_v24  ;;  %441 = vmatpush1.bf16.msra.mxu1 %v402_v24  ;;  %v226_v28 = vsel %vm106_vm2, %v565_v23, %v556_v21 }
  0xfa   :  { %v574_v29 = vpop.permute.xlu1 %573  ;;  %v227_v31 = vsel %vm106_vm2, %v556_v21, %v560_v27  ;;  %v224_v32 = vsel %vm106_vm2, %v561_v25, %v551_v16 }
  0xfb   :  { %v569_v33 = vpop.permute.xlu0 %568  ;;  %v575_v35 = vunpack.i.l.bf16 %v574_v29  ;;  %v404_v36 = vpack.c.bf16 %v227_v31, %v225_v30  ;;  %v406_v39 = vpack.c.bf16 %v226_v28, %v224_v32  ;;  %v576_v43 = vunpack.i.h.bf16 %v574_v29 }
  0xfc   :  { %v571_v41 = vunpack.i.h.bf16 %v569_v33  ;;  %v570_v42 = vunpack.i.l.bf16 %v569_v33 }
  0xfd   :  { %405 = vmatprep.subr.bf16.mxu0 %v404_v36  ;;  %429 = vmatprep.subr.bf16.mxu1 %v404_v36  ;;  %v228_v56 = vsel %vm106_vm2, %v576_v43, %v566_v40 }
  0xfe   :  { %407 = vmatpush1.bf16.msra.mxu0 %v406_v39  ;;  %442 = vmatpush1.bf16.msra.mxu1 %v406_v39  ;;  %v584_v47 = vpop.permute.xlu1 %583  ;;  %v229_v48 = vsel %vm106_vm2, %v566_v40, %v570_v42  ;;  %v231_v49 = vsel %vm106_vm2, %v571_v41, %v575_v35 }
  0xff   :  { %v579_v50 = vpop.permute.xlu0 %578  ;;  %v408_v51 = vpack.c.bf16 %v231_v49, %v229_v48  ;;  %v585_v55 = vunpack.i.l.bf16 %v584_v47  ;;  %v586_v5 = vunpack.i.h.bf16 %v584_v47 }
 0x100   :  { %v580_v52 = vunpack.i.l.bf16 %v579_v50  ;;  %v581_v53 = vunpack.i.h.bf16 %v579_v50 }
 0x101   :  { %409 = vmatprep.subr.bf16.mxu0 %v408_v51  ;;  %430 = vmatprep.subr.bf16.mxu1 %v408_v51 }
 0x102   :  { %v230_v58 = vsel %vm106_vm2, %v580_v52, %v571_v41  ;;  %v233_v62 = vsel %vm106_vm2, %v581_v53, %v585_v55 }
 0x103   :  { %v589_v59 = vpop.permute.xlu0 %588  ;;  %v594_v60 = vpop.permute.xlu1 %593  ;;  %v410_v61 = vpack.c.bf16 %v230_v58, %v228_v56 }
 0x104   :  { %v591_v2 = vunpack.i.h.bf16 %v589_v59  ;;  %v590_v6 = vunpack.i.l.bf16 %v589_v59  ;;  %v595_v26 = vunpack.i.l.bf16 %v594_v60  ;;  %v596_v45 = vunpack.i.h.bf16 %v594_v60 }
 0x105   :  { %411 = vmatpush1.bf16.msra.mxu0 %v410_v61  ;;  %443 = vmatpush1.bf16.msra.mxu1 %v410_v61 }
 0x106   :  { %v235_v63 = vsel %vm106_vm2, %v586_v5, %v590_v6  ;;  %v232_v0 = vsel %vm106_vm2, %v591_v2, %v581_v53  ;;  %v234_v34 = vsel %vm106_vm2, %v595_v26, %v586_v5 }
 0x107   :  { %v599_v37 = vpop.permute.xlu0 %598  ;;  %v412_v38 = vpack.c.bf16 %v235_v63, %v233_v62  ;;  %v414_v44 = vpack.c.bf16 %v234_v34, %v232_v0  ;;  %v219_v57 = vpop.permute.xlu1 %218 }
 0x108   :  { %v601_v46 = vunpack.i.h.bf16 %v599_v37  ;;  %v600_v54 = vunpack.i.l.bf16 %v599_v37 }
 0x109   :  { %413 = vmatprep.subr.bf16.mxu0 %v412_v38  ;;  %431 = vmatprep.subr.bf16.mxu1 %v412_v38 }
 0x10a   :  { %v236_v1 = vsel %vm106_vm2, %v601_v46, %v596_v45  ;;  %v237_v3 = vsel %vm106_vm2, %v596_v45, %v600_v54  ;;  %415 = vmatpush1.bf16.msra.mxu0 %v414_v44  ;;  %444 = vmatpush1.bf16.msra.mxu1 %v414_v44 }
 0x10b   :  { %v416_v4 = vpack.c.bf16 %v219_v57, %v237_v3  ;;  %v418_v7 = vpack.c.bf16 %v219_v57, %v236_v1 }
 0x10d   :  { %417 = vmatprep.subr.bf16.mxu0 %v416_v4  ;;  %432 = vmatprep.subr.bf16.mxu1 %v416_v4 }
 0x10e   :  { %419 = vmatpush1.bf16.msra.mxu0 %v418_v7  ;;  %445 = vmatpush1.bf16.msra.mxu1 %v418_v7 }
 0x111   :  { %333 = vmatmul.mubr.f32.vlgmr.msra.gmra.mrb[0].mxu0 %v257_v8  ;;  %339 = vmatmul.mubr.f32.vlgmr.msra.gmra.mrb[0].mxu1 %v259_v9 }
 0x1e4   :  { %v334_v10 = vpop.f32.mrb[0].mxu0  ;;  %v340_v11 = vpop.f32.mrb[0].mxu1 }
 0x1e5   :  { %v345_v12 = vmul.f32 %v334_v10, %v334_v10  ;;  %v347_v13 = vmul.f32 %v340_v11, %v340_v11  ;;  %v336_v14 = vpop.f32.mrb[1].mxu0  ;;  %v342_v15 = vpop.f32.mrb[1].mxu1 }
 0x1e6   :  { %v346_v16 = vmul.f32 %v336_v14, %v336_v14  ;;  %v348_v17 = vmul.f32 %v342_v15, %v342_v15 }
 0x1e7   :  { %349 = vst [vmem:[%s842_s2] sm:$0xff] %v345_v12  ;;  %351 = vst [vmem:[%s842_s2 + $0x10] sm:$0xff] %v347_v13 }
 0x1e8   :  { %350 = vst [vmem:[%s842_s2 + $0x8] sm:$0xff] %v346_v16  ;;  %352 = vst [vmem:[%s842_s2 + $0x18] sm:$0xff] %v348_v17 }

</bundles_post_ra>
